<compile_context>
chip_gen: v7x
topology: tpu7x:2x2x1
jax: 0.10.0
libtpu: 0.0.40
codegen_flags: <defaults>
</compile_context>

<pallas_src>
import functools
import math

import jax
import jax.numpy as jnp
from jax.experimental import pallas as pl
from jax.experimental.pallas import tpu as pltpu


def _round_up(x, m):
    return (x + m - 1) // m * m


# ----------------------------- Pallas kernel --------------------------------

def mfcc_kernel(frames_ref, dft_ref, mel_ref, dct_ref, out_ref, *, n_freq_pad):
    # Windowed real DFT via ONE matmul against the fused [n_fft_pad, 2*n_freq_pad]
    # (window already folded into the weights).  bf16 x bf16 -> f32 accum.
    spec = jnp.dot(frames_ref[...], dft_ref[...],
                   preferred_element_type=jnp.float32)        # [T, 2*n_freq_pad]
    xr = spec[:, :n_freq_pad]
    xi = spec[:, n_freq_pad:]
    power = xr * xr + xi * xi                                  # [T, n_freq_pad]

    # Mel filterbank (bf16 weights, padded freq/mel rows are zero).
    mel = jnp.dot(power.astype(mel_ref.dtype), mel_ref[...],
                  preferred_element_type=jnp.float32)          # [T, n_mel_pad]

    # AmplitudeToDB(power): 10*log10(clamp(x, 1e-10)).  The 10/ln(10) scale is
    # folded into the DCT matrix, so only the natural log (EUP) remains here.
    # TODO(synk): torchaudio's MFCC also applies a top_db=80 clamp against the
    # global max of the spectrogram; the reference module's intent is ambiguous
    # and a global max breaks single-pass tiling, so it is omitted (same as the
    # previously accepted version).
    mel_db = jnp.log(jnp.maximum(mel, 1e-10))

    # DCT-II (ortho, dB scale folded in).  Kept f32: post-log values, and this
    # matmul is only ~1/16 of the DFT matmul's FLOPs.
    out_ref[...] = jnp.dot(mel_db, dct_ref[...],
                           preferred_element_type=jnp.float32)  # [T, n_mfcc_pad]


# ----------------------------- parameter setup -------------------------------

def _hann_window(n_fft):
    n = jnp.arange(n_fft, dtype=jnp.float32)
    return 0.5 - 0.5 * jnp.cos(2.0 * jnp.pi * n / n_fft)       # periodic hann


def _windowed_dft_matrix(n_fft, n_fft_pad, n_freq_pad):
    """Fused [n_fft_pad, 2*n_freq_pad] matrix: window*cos | window*sin (zero-padded)."""
    n_freqs = n_fft // 2 + 1
    n = jnp.arange(n_fft, dtype=jnp.float32)[:, None]
    f = jnp.arange(n_freqs, dtype=jnp.float32)[None, :]
    ang = 2.0 * jnp.pi * n * f / n_fft
    win = _hann_window(n_fft)[:, None]
    m = jnp.zeros((n_fft_pad, 2 * n_freq_pad), jnp.float32)
    m = m.at[:n_fft, :n_freqs].set(jnp.cos(ang) * win)
    m = m.at[:n_fft, n_freq_pad:n_freq_pad + n_freqs].set(jnp.sin(ang) * win)
    return m


def _melscale_fbanks_padded(n_freqs, n_freq_pad, f_min, f_max,
                            n_mels, n_mel_pad, sample_rate):
    # torchaudio.functional.melscale_fbanks, mel_scale="htk", norm=None
    all_freqs = jnp.linspace(0.0, sample_rate // 2, n_freqs)

    def hz_to_mel(fz):
        return 2595.0 * jnp.log10(1.0 + fz / 700.0)

    def mel_to_hz(m):
        return 700.0 * (10.0 ** (m / 2595.0) - 1.0)

    m_min = hz_to_mel(jnp.asarray(f_min, jnp.float32))
    m_max = hz_to_mel(jnp.asarray(f_max, jnp.float32))
    m_pts = jnp.linspace(m_min, m_max, n_mels + 2)
    f_pts = mel_to_hz(m_pts)
    f_diff = f_pts[1:] - f_pts[:-1]
    slopes = f_pts[None, :] - all_freqs[:, None]                # [n_freqs, n_mels+2]
    down = -slopes[:, :-2] / f_diff[:-1]
    up = slopes[:, 2:] / f_diff[1:]
    fb = jnp.clip(jnp.minimum(down, up), 0.0, None)             # [n_freqs, n_mels]
    out = jnp.zeros((n_freq_pad, n_mel_pad), jnp.float32)
    return out.at[:n_freqs, :n_mels].set(fb)


def _create_dct_padded(n_mfcc, n_mfcc_pad, n_mels, n_mel_pad):
    # torchaudio.functional.create_dct(norm='ortho'), with the AmplitudeToDB
    # scale 10/ln(10) folded in.  Padded rows/cols are zero so padded mel bins
    # contribute nothing and padded MFCC lanes are zero.
    n = jnp.arange(n_mels, dtype=jnp.float32)
    k = jnp.arange(n_mfcc, dtype=jnp.float32)[:, None]
    dct = jnp.cos(jnp.pi / n_mels * (n + 0.5) * k)              # [n_mfcc, n_mels]
    dct = dct.at[0].multiply(1.0 / math.sqrt(2.0))
    dct = dct * math.sqrt(2.0 / n_mels)
    dct = dct * (10.0 / math.log(10.0))                         # fold dB scale
    out = jnp.zeros((n_mel_pad, n_mfcc_pad), jnp.float32)
    return out.at[:n_mels, :n_mfcc].set(dct.T)


# ----------------------------- single extractor ------------------------------

def mfcc_extract(waveform,
                 sample_rate=16000,
                 n_mfcc=40,
                 n_fft=400,
                 hop_length=160,
                 n_mels=80,
                 f_min=0.0,
                 f_max=None):
    """MFCCExtractor.forward equivalent.

    Args:
      waveform: [samples] or [1, samples] float32
    Returns:
      mfcc: [1, n_mfcc, time_frames] float32
    """
    f_max = f_max if f_max is not None else sample_rate / 2.0
    if waveform.ndim == 1:
        waveform = waveform[None, :]
    x = waveform[0].astype(jnp.float32)
    n_samples = x.shape[0]

    # Padded / MXU-aligned dimensions.
    n_freqs = n_fft // 2 + 1
    n_fft_pad = _round_up(n_fft, 128)        # 400 -> 512
    n_freq_pad = _round_up(n_freqs, 128)     # 201 -> 256
    n_mel_pad = _round_up(n_mels, 128)       # 80  -> 128
    n_mfcc_pad = _round_up(n_mfcc, 128)      # 40  -> 128 (lane-dense output)

    # --- glue: reflect pad (center=True) and frame extraction (XLA side) ---
    pad = n_fft // 2
    xp = jnp.pad(x, (pad, pad), mode="reflect")
    n_frames = 1 + n_samples // hop_length
    idx = (jnp.arange(n_frames)[:, None] * hop_length
           + jnp.arange(n_fft)[None, :])
    frames = xp[idx]                                            # [T, n_fft]

    # Tile the time axis; pad frames to (t_pad, n_fft_pad) and cast to bf16.
    t_tile = min(256, _round_up(n_frames, 16))
    t_pad = _round_up(n_frames, t_tile)
    frames = jnp.pad(frames, ((0, t_pad - n_frames), (0, n_fft_pad - n_fft)))
    frames = frames.astype(jnp.bfloat16)

    # --- deterministic "parameters" (windowed DFT, mel fb, scaled DCT) ---
    dft_mat = _windowed_dft_matrix(n_fft, n_fft_pad, n_freq_pad).astype(jnp.bfloat16)
    mel_fb = _melscale_fbanks_padded(n_freqs, n_freq_pad, f_min, f_max,
                                     n_mels, n_mel_pad, sample_rate).astype(jnp.bfloat16)
    dct_mat = _create_dct_padded(n_mfcc, n_mfcc_pad, n_mels, n_mel_pad)   # f32

    kernel = functools.partial(mfcc_kernel, n_freq_pad=n_freq_pad)

    # Constant matrices (~0.7 MB total) use a fixed block index (0, 0) so the
    # pipeline only re-DMAs the frame tiles; the grid axis is "parallel" so
    # v7x shards frame tiles across its two TensorCores.
    out = pl.pallas_call(
        kernel,
        out_shape=jax.ShapeDtypeStruct((t_pad, n_mfcc_pad), jnp.float32),
        grid=(t_pad // t_tile,),
        in_specs=[
            pl.BlockSpec((t_tile, n_fft_pad), lambda i: (i, 0)),
            pl.BlockSpec((n_fft_pad, 2 * n_freq_pad), lambda i: (0, 0)),
            pl.BlockSpec((n_freq_pad, n_mel_pad), lambda i: (0, 0)),
            pl.BlockSpec((n_mel_pad, n_mfcc_pad), lambda i: (0, 0)),
        ],
        out_specs=pl.BlockSpec((t_tile, n_mfcc_pad), lambda i: (i, 0)),
        compiler_params=pltpu.CompilerParams(
            dimension_semantics=("parallel",),
            vmem_limit_bytes=32 << 20),
    )(frames, dft_mat, mel_fb, dct_mat)

    # Slice off time/coefficient padding; [T, n_mfcc] -> [1, n_mfcc, T].
    return out[:n_frames, :n_mfcc].T[None, :, :]


# ----------------------------- CombinedExtractor -----------------------------

def combined_extract(waveform, extractors):
    """CombinedExtractor.forward: run each extractor, concat along dim=1."""
    feats = [fn(waveform) for fn in extractors.values()]
    return jnp.concatenate(feats, axis=1)


# ----------------------------- main ------------------------------------------

if __name__ == "__main__":
    key = jax.random.PRNGKey(0)
    n_samples = 1600  # 0.1 s at 16 kHz -> 11 time frames
    waveform = jax.random.normal(key, (1, n_samples), dtype=jnp.float32)

    extractors = {
        "mfcc": functools.partial(mfcc_extract, n_mfcc=40, n_mels=80),
        "mfcc_lo": functools.partial(mfcc_extract, n_mfcc=13, n_mels=80),
    }
    feats = combined_extract(waveform, extractors)
    jax.block_until_ready(feats)

    t = 1 + n_samples // 160
    assert feats.shape == (1, 40 + 13, t), feats.shape
    assert feats.dtype == jnp.float32
    assert bool(jnp.all(jnp.isfinite(feats)))
    print("KERNEL_OK")
</pallas_src>

<mosaic_0001>
module attributes {stable_mosaic.version = 11 : i64} {
  func.func @mfcc_kernel(%arg0: i32, %arg1: memref<16x512xbf16, #tpu.memory_space<vmem>>, %arg2: memref<512x512xbf16, #tpu.memory_space<vmem>>, %arg3: memref<256x128xbf16, #tpu.memory_space<vmem>>, %arg4: memref<128x128xf32, #tpu.memory_space<vmem>>, %arg5: memref<16x128xf32, #tpu.memory_space<vmem>>) attributes {dimension_semantics = [#tpu.dimension_semantics<parallel>], iteration_bounds = array<i64: 1>, scalar_prefetch = 0 : i64, scratch_operands = 0 : i64, tpu.core_type = #tpu.core_type<tc>, window_params = [{transform_indices = @transform_0, window_bounds = array<i64: 16, 512>}, {pipeline_mode = #tpu.pipeline_mode<synchronous>, transform_indices = @transform_1, window_bounds = array<i64: 512, 512>}, {pipeline_mode = #tpu.pipeline_mode<synchronous>, transform_indices = @transform_2, window_bounds = array<i64: 256, 128>}, {pipeline_mode = #tpu.pipeline_mode<synchronous>, transform_indices = @transform_3, window_bounds = array<i64: 128, 128>}, {transform_indices = @transform_4, window_bounds = array<i64: 16, 128>}]} {
    %c0 = arith.constant 0 : index
    %c0_0 = arith.constant 0 : index
    %0 = vector.load %arg1[%c0, %c0_0] : memref<16x512xbf16, #tpu.memory_space<vmem>>, vector<16x512xbf16>
    %c0_1 = arith.constant 0 : index
    %c0_2 = arith.constant 0 : index
    %1 = vector.load %arg2[%c0_1, %c0_2] : memref<512x512xbf16, #tpu.memory_space<vmem>>, vector<512x512xbf16>
    %cst = arith.constant dense<0.000000e+00> : vector<16x512xf32>
    %2 = tpu.matmul %0, %1, %cst {dimension_numbers = #tpu.dot_dimension_numbers<[1], [0], [0], [1], [0, 0, 1, 1], [], []>} : vector<16x512xbf16>, vector<512x512xbf16>, vector<16x512xf32> -> vector<16x512xf32>
    %3 = vector.extract_strided_slice %2 {offsets = [0, 0], sizes = [16, 256], strides = [1, 1]} : vector<16x512xf32> to vector<16x256xf32>
    %4 = vector.extract_strided_slice %2 {offsets = [0, 256], sizes = [16, 256], strides = [1, 1]} : vector<16x512xf32> to vector<16x256xf32>
    %5 = arith.mulf %3, %3 : vector<16x256xf32>
    %6 = arith.mulf %4, %4 : vector<16x256xf32>
    %7 = arith.addf %5, %6 : vector<16x256xf32>
    %8 = arith.truncf %7 : vector<16x256xf32> to vector<16x256xbf16>
    %c0_3 = arith.constant 0 : index
    %c0_4 = arith.constant 0 : index
    %9 = vector.load %arg3[%c0_3, %c0_4] : memref<256x128xbf16, #tpu.memory_space<vmem>>, vector<256x128xbf16>
    %cst_5 = arith.constant dense<0.000000e+00> : vector<16x128xf32>
    %10 = tpu.matmul %8, %9, %cst_5 {dimension_numbers = #tpu.dot_dimension_numbers<[1], [0], [0], [1], [0, 0, 1, 1], [], []>} : vector<16x256xbf16>, vector<256x128xbf16>, vector<16x128xf32> -> vector<16x128xf32>
    %cst_6 = arith.constant 1.000000e-10 : f32
    %11 = vector.broadcast %cst_6 : f32 to vector<16x128xf32>
    %12 = arith.maximumf %10, %11 : vector<16x128xf32>
    %13 = math.log %12 : vector<16x128xf32>
    %c0_7 = arith.constant 0 : index
    %c0_8 = arith.constant 0 : index
    %14 = vector.load %arg4[%c0_7, %c0_8] : memref<128x128xf32, #tpu.memory_space<vmem>>, vector<128x128xf32>
    %cst_9 = arith.constant dense<0.000000e+00> : vector<16x128xf32>
    %15 = tpu.matmul %13, %14, %cst_9 {dimension_numbers = #tpu.dot_dimension_numbers<[1], [0], [0], [1], [0, 0, 1, 1], [], []>} : vector<16x128xf32>, vector<128x128xf32>, vector<16x128xf32> -> vector<16x128xf32>
    %c0_10 = arith.constant 0 : index
    %c0_11 = arith.constant 0 : index
    %16 = vector.load %arg5[%c0_10, %c0_11] : memref<16x128xf32, #tpu.memory_space<vmem>>, vector<16x128xf32>
    tpu.vector_store %arg5[%c0_10, %c0_11], %15 {strides = array<i32>} : memref<16x128xf32, #tpu.memory_space<vmem>>, vector<16x128xf32>,
    return
  }
  func.func @transform_0(%arg0: i32) -> (i32, i32) {
    %c0_i32 = arith.constant 0 : i32
    %c0_i32_0 = arith.constant 0 : i32
    return %arg0, %c0_i32 : i32, i32
  }
  func.func @transform_1(%arg0: i32) -> (i32, i32) {
    %c0_i32 = arith.constant 0 : i32
    %c0_i32_0 = arith.constant 0 : i32
    %c0_i32_1 = arith.constant 0 : i32
    return %c0_i32, %c0_i32_0 : i32, i32
  }
  func.func @transform_2(%arg0: i32) -> (i32, i32) {
    %c0_i32 = arith.constant 0 : i32
    %c0_i32_0 = arith.constant 0 : i32
    %c0_i32_1 = arith.constant 0 : i32
    return %c0_i32, %c0_i32_0 : i32, i32
  }
  func.func @transform_3(%arg0: i32) -> (i32, i32) {
    %c0_i32 = arith.constant 0 : i32
    %c0_i32_0 = arith.constant 0 : i32
    %c0_i32_1 = arith.constant 0 : i32
    return %c0_i32, %c0_i32_0 : i32, i32
  }
  func.func @transform_4(%arg0: i32) -> (i32, i32) {
    %c0_i32 = arith.constant 0 : i32
    %c0_i32_0 = arith.constant 0 : i32
    return %arg0, %c0_i32 : i32, i32
  }
}

</mosaic_0001>

<bundles_post_ra>
// kernel: tpu_custom_call.1
= control target key start
LH: loop header
LB: loop body
LE: loop exit
PB: predicated region body
PF: predicated region fallthrough
CT: control target
= control target key end

     0   :  { %9 = vsyncpa [#allocation3], 0  ;;  %s2058_s0 = inlined_call_operand.hbm [shape: bf16[16,512], index: 0, kind: input, shape index: {}]   ;;  %s2059_s1 = inlined_call_operand.hbm [shape: bf16[512,512], index: 1, kind: input, shape index: {}]   ;;  %s2060_s2 = inlined_call_operand.hbm [shape: bf16[256,128], index: 2, kind: input, shape index: {}]   ;;  %s2061_s3 = inlined_call_operand.hbm [shape: f32[128,128], index: 3, kind: input, shape index: {}]   ;;  %s2062_s4 = inlined_call_operand.hbm [shape: f32[16,128], index: 4, kind: output, shape index: {}]  }
   0x1   :  { %10 = vsyncpa [#allocation6], 0 }
   0x2   :  { %11 = vsyncpa [#allocation9], 0 }
   0x3   :  { %12 = vsyncpa [#allocation4], 0  ;;  %s1949_s15 = smov [#allocation5]   ;;  %s1950_s17 = smov [#allocation2]  }
   0x4   :  { %s30_s16 = sshll.u32 %s1949_s15, 4  ;;  %s18_s18 = sshll.u32 %s1950_s17, 4  ;;  %s31_s16 = int_to_ptr.vmem [resolvable:$true] %s30_s16  ;;  %s1985_s18 = int_to_ptr.vmem [resolvable:$true] %s18_s18 }
   0x5   :  { %s1831_s21 = scalar_lea.hbm %s2059_s1, 16384 }
   0x6   :  { %p1832_p0 = scmp.ne.s32.totalorder %s2059_s1, %s1831_s21  ;;  %p1835_p1 = scmp.lt.u32.totalorder %s1831_s21, %s2059_s1 }
   0x8   :  { %p1837_p2 = pnand %p1835_p1, %p1832_p0 }
   0xa   :  { %1840 = shalt.err (!%p1837_p2)
}
   0xb   :  { %s1841_s26 = scalar_lea.vmem %s31_s16, 16384  ;;  %p1846_p4 = scmp.lt.s32.totalorder %s31_s16, %s31_s16 }
   0xc   :  { %p1842_p3 = scmp.ne.s32.totalorder %s31_s16, %s1841_s26  ;;  %p1847_p5 = scmp.lt.s32.totalorder %s1841_s26, %s1841_s26 }
   0xe   :  { %p1848_p6 = por %p1847_p5, %p1846_p4 }
  0x10   :  { %p1849_p7 = pnand %p1848_p6, %p1842_p3 }
  0x12   :  { %1852 = shalt.err (!%p1849_p7)
}
  0x13   :  { %s1951_s27 = smov 256   ;;  %s1952_s28 = smov 16  }
  0x14   :  { %36 = dma.hbm_to_vmem [thread:$0]  %s2059_s1, 16384, %s31_s16, [#allocation6], %s1951_s27, %s1951_s27, %s1952_s28  }
  0x15   :  { %s1853_s7 = scalar_lea.hbm %s2058_s0, 512 }
  0x16   :  { %p1854_p8 = scmp.ne.s32.totalorder %s2058_s0, %s1853_s7  ;;  %p1857_p9 = scmp.lt.u32.totalorder %s1853_s7, %s2058_s0 }
  0x18   :  { %p1859_p10 = pnand %p1857_p9, %p1854_p8 }
  0x1a   :  { %1862 = shalt.err (!%p1859_p10)
}
  0x1b   :  { %s1863_s12 = scalar_lea.vmem %s1985_s18, 512  ;;  %p1868_p12 = scmp.lt.s32.totalorder %s1985_s18, %s1985_s18 }
  0x1c   :  { %p1864_p11 = scmp.ne.s32.totalorder %s1985_s18, %s1863_s12  ;;  %p1869_p13 = scmp.lt.s32.totalorder %s1863_s12, %s1863_s12 }
  0x1e   :  { %p1870_p0 = por %p1869_p13, %p1868_p12 }
  0x20   :  { %p1871_p1 = pnand %p1870_p0, %p1864_p11 }
  0x22   :  { %1874 = shalt.err (!%p1871_p1)
}
  0x23   :  { %24 = dma.hbm_to_vmem [thread:$0]  %s2058_s0, 512, %s1985_s18, [#allocation3], %s1951_s27, %s1951_s27, %s1952_s28  }
  0x24   :  { %s1953_s14 = smov [#allocation7]   ;;  %s1875_s19 = scalar_lea.hbm %s2060_s2, 2048 }
  0x25   :  { %s42_s15 = sshll.u32 %s1953_s14, 4  ;;  %p1876_p2 = scmp.ne.s32.totalorder %s2060_s2, %s1875_s19  ;;  %s43_s15 = int_to_ptr.vmem [resolvable:$true] %s42_s15 }
  0x26   :  { %p1879_p3 = scmp.lt.u32.totalorder %s1875_s19, %s2060_s2 }
  0x28   :  { %p1881_p4 = pnand %p1879_p3, %p1876_p2 }
  0x2a   :  { %1884 = shalt.err (!%p1881_p4)
}
  0x2b   :  { %s1885_s24 = scalar_lea.vmem %s43_s15, 2048  ;;  %p1890_p6 = scmp.lt.s32.totalorder %s43_s15, %s43_s15 }
  0x2c   :  { %p1886_p5 = scmp.ne.s32.totalorder %s43_s15, %s1885_s24  ;;  %p1891_p7 = scmp.lt.s32.totalorder %s1885_s24, %s1885_s24 }
  0x2e   :  { %p1892_p8 = por %p1891_p7, %p1890_p6 }
  0x30   :  { %p1893_p9 = pnand %p1892_p8, %p1886_p5 }
  0x32   :  { %1896 = shalt.err (!%p1893_p9)
}
  0x33   :  { %s1954_s0 = smov 64   ;;  %s1955_s18 = smov 4  }
  0x34   :  { %48 = dma.hbm_to_vmem [thread:$0]  %s2060_s2, 2048, %s43_s15, [#allocation6], %s1954_s0, %s1954_s0, %s1955_s18  }
  0x35   :  { %s1956_s27 = smov [#allocation8]   ;;  %s1897_s5 = scalar_lea.hbm %s2061_s3, 2048 }
  0x36   :  { %s54_s28 = sshll.u32 %s1956_s27, 4  ;;  %p1898_p10 = scmp.ne.s32.totalorder %s2061_s3, %s1897_s5  ;;  %s55_s28 = int_to_ptr.vmem [resolvable:$true] %s54_s28 }
  0x37   :  { %p1901_p11 = scmp.lt.u32.totalorder %s1897_s5, %s2061_s3 }
  0x39   :  { %p1903_p12 = pnand %p1901_p11, %p1898_p10 }
  0x3b   :  { %1906 = shalt.err (!%p1903_p12)
}
  0x3c   :  { %s1907_s10 = scalar_lea.vmem %s55_s28, 2048  ;;  %p1912_p0 = scmp.lt.s32.totalorder %s55_s28, %s55_s28 }
  0x3d   :  { %p1908_p13 = scmp.ne.s32.totalorder %s55_s28, %s1907_s10  ;;  %p1913_p1 = scmp.lt.s32.totalorder %s1907_s10, %s1907_s10 }
  0x3f   :  { %p1914_p2 = por %p1913_p1, %p1912_p0 }
  0x41   :  { %p1915_p3 = pnand %p1914_p2, %p1908_p13 }
  0x43   :  { %1918 = shalt.err (!%p1915_p3)
}
  0x44   :  { %s1957_s2 = smov 128   ;;  %s1958_s11 = smov 8  }
  0x45   :  { %60 = dma.hbm_to_vmem [thread:$0]  %s2061_s3, 2048, %s55_s28, [#allocation9], %s1957_s2, %s1957_s2, %s1958_s11  }
  0x46   :  { %1941 = dma.done.wait [#allocation3], 512  }
  0x47   :  { %1942 = vsyncadd [#allocation3], 4294966784 }
  0x48   :  { %1943 = dma.done.wait [#allocation6], 18432  }
  0x49   :  { %1944 = vsyncadd [#allocation6], 4294948864 }
  0x4a   :  { %1945 = dma.done.wait [#allocation9], 2048  }
  0x4b   :  { %1946 = vsyncadd [#allocation9], 4294965248  ;;  %v1613_v0 = vld [vmem:[#allocation5 + $0x4] ss:$16 sps:$4 sm:$0xff]   ;;  %v1615_v1 = vld [vmem:[#allocation5 + $0xc] ss:$16 sps:$4 sm:$0xff]  }
  0x4c   :  { %866 = vmatprep.subr.bf16.mxu0 %v1613_v0  ;;  %v1617_v2 = vld [vmem:[#allocation5] ss:$16 sps:$4 sm:$0xff]   ;;  %v1618_v3 = vld [vmem:[#allocation5 + $0x8] ss:$16 sps:$4 sm:$0xff]   ;;  %952 = vmatprep.subr.bf16.mxu1 %v1615_v1  ;;  %v1619_v4 = vld [vmem:[#allocation5 + $0x24] ss:$16 sps:$4 sm:$0xff]  }
  0x4d   :  { %867 = vmatpush1.bf16.msra.mxu0 %v1617_v2  ;;  %953 = vmatpush1.bf16.msra.mxu1 %v1618_v3  ;;  %v1621_v5 = vld [vmem:[#allocation5 + $0x2c] ss:$16 sps:$4 sm:$0xff]   ;;  %v1623_v6 = vld [vmem:[#allocation5 + $0x20] ss:$16 sps:$4 sm:$0xff]   ;;  %v1624_v7 = vld [vmem:[#allocation5 + $0x28] ss:$16 sps:$4 sm:$0xff]  }
  0x4e   :  { %868 = vmatprep.subr.bf16.mxu0 %v1619_v4  ;;  %954 = vmatprep.subr.bf16.mxu1 %v1621_v5  ;;  %v1625_v8 = vld [vmem:[#allocation5 + $0x44] ss:$16 sps:$4 sm:$0xff]   ;;  %v1627_v9 = vld [vmem:[#allocation5 + $0x4c] ss:$16 sps:$4 sm:$0xff]   ;;  %v1629_v10 = vld [vmem:[#allocation5 + $0x40] ss:$16 sps:$4 sm:$0xff]  }
  0x4f   :  { %v1630_v11 = vld [vmem:[#allocation5 + $0x48] ss:$16 sps:$4 sm:$0xff]   ;;  %v1631_v12 = vld [vmem:[#allocation5 + $0x64] ss:$16 sps:$4 sm:$0xff]   ;;  %v1633_v13 = vld [vmem:[#allocation5 + $0x6c] ss:$16 sps:$4 sm:$0xff]  }
  0x50   :  { %v1635_v14 = vld [vmem:[#allocation5 + $0x60] ss:$16 sps:$4 sm:$0xff]   ;;  %v1636_v15 = vld [vmem:[#allocation5 + $0x68] ss:$16 sps:$4 sm:$0xff]   ;;  %v1637_v16 = vld [vmem:[#allocation5 + $0x84] ss:$16 sps:$4 sm:$0xff]  }
  0x51   :  { %869 = vmatpush1.bf16.msra.mxu0 %v1623_v6  ;;  %955 = vmatpush1.bf16.msra.mxu1 %v1624_v7  ;;  %v1639_v17 = vld [vmem:[#allocation5 + $0x8c] ss:$16 sps:$4 sm:$0xff]   ;;  %v1641_v18 = vld [vmem:[#allocation5 + $0x80] ss:$16 sps:$4 sm:$0xff]   ;;  %v1642_v19 = vld [vmem:[#allocation5 + $0x88] ss:$16 sps:$4 sm:$0xff]  }
  0x52   :  { %870 = vmatprep.subr.bf16.mxu0 %v1625_v8  ;;  %956 = vmatprep.subr.bf16.mxu1 %v1627_v9  ;;  %v1643_v20 = vld [vmem:[#allocation5 + $0xa4] ss:$16 sps:$4 sm:$0xff]   ;;  %v1645_v21 = vld [vmem:[#allocation5 + $0xac] ss:$16 sps:$4 sm:$0xff]   ;;  %v1647_v22 = vld [vmem:[#allocation5 + $0xa0] ss:$16 sps:$4 sm:$0xff]  }
  0x53   :  { %v1648_v23 = vld [vmem:[#allocation5 + $0xa8] ss:$16 sps:$4 sm:$0xff]   ;;  %v1649_v24 = vld [vmem:[#allocation5 + $0xc4] ss:$16 sps:$4 sm:$0xff]   ;;  %v1651_v25 = vld [vmem:[#allocation5 + $0xcc] ss:$16 sps:$4 sm:$0xff]  }
  0x54   :  { %v1653_v26 = vld [vmem:[#allocation5 + $0xc0] ss:$16 sps:$4 sm:$0xff]   ;;  %v1654_v27 = vld [vmem:[#allocation5 + $0xc8] ss:$16 sps:$4 sm:$0xff]   ;;  %v1655_v28 = vld [vmem:[#allocation5 + $0xe4] ss:$16 sps:$4 sm:$0xff]  }
  0x55   :  { %871 = vmatpush1.bf16.msra.mxu0 %v1629_v10  ;;  %957 = vmatpush1.bf16.msra.mxu1 %v1630_v11  ;;  %v1657_v29 = vld [vmem:[#allocation5 + $0xec] ss:$16 sps:$4 sm:$0xff]   ;;  %v1659_v30 = vld [vmem:[#allocation5 + $0xe0] ss:$16 sps:$4 sm:$0xff]   ;;  %v1660_v31 = vld [vmem:[#allocation5 + $0xe8] ss:$16 sps:$4 sm:$0xff]  }
  0x56   :  { %872 = vmatprep.subr.bf16.mxu0 %v1631_v12  ;;  %958 = vmatprep.subr.bf16.mxu1 %v1633_v13  ;;  %v1661_v32 = vld [vmem:[#allocation5 + $0x104] ss:$16 sps:$4 sm:$0xff]   ;;  %v1663_v33 = vld [vmem:[#allocation5 + $0x10c] ss:$16 sps:$4 sm:$0xff]   ;;  %v1665_v34 = vld [vmem:[#allocation5 + $0x100] ss:$16 sps:$4 sm:$0xff]  }
  0x57   :  { %v1666_v35 = vld [vmem:[#allocation5 + $0x108] ss:$16 sps:$4 sm:$0xff]   ;;  %v1667_v36 = vld [vmem:[#allocation5 + $0x124] ss:$16 sps:$4 sm:$0xff]   ;;  %v1669_v37 = vld [vmem:[#allocation5 + $0x12c] ss:$16 sps:$4 sm:$0xff]  }
  0x58   :  { %v1671_v38 = vld [vmem:[#allocation5 + $0x120] ss:$16 sps:$4 sm:$0xff]   ;;  %v1672_v39 = vld [vmem:[#allocation5 + $0x128] ss:$16 sps:$4 sm:$0xff]   ;;  %v1673_v40 = vld [vmem:[#allocation5 + $0x144] ss:$16 sps:$4 sm:$0xff]  }
  0x59   :  { %873 = vmatpush1.bf16.msra.mxu0 %v1635_v14  ;;  %959 = vmatpush1.bf16.msra.mxu1 %v1636_v15  ;;  %v1675_v41 = vld [vmem:[#allocation5 + $0x14c] ss:$16 sps:$4 sm:$0xff]   ;;  %v1677_v42 = vld [vmem:[#allocation5 + $0x140] ss:$16 sps:$4 sm:$0xff]   ;;  %v1678_v43 = vld [vmem:[#allocation5 + $0x148] ss:$16 sps:$4 sm:$0xff]  }
  0x5a   :  { %874 = vmatprep.subr.bf16.mxu0 %v1637_v16  ;;  %960 = vmatprep.subr.bf16.mxu1 %v1639_v17  ;;  %v1679_v44 = vld [vmem:[#allocation5 + $0x164] ss:$16 sps:$4 sm:$0xff]   ;;  %v1681_v45 = vld [vmem:[#allocation5 + $0x16c] ss:$16 sps:$4 sm:$0xff]   ;;  %v1683_v46 = vld [vmem:[#allocation5 + $0x160] ss:$16 sps:$4 sm:$0xff]  }
  0x5b   :  { %v1684_v47 = vld [vmem:[#allocation5 + $0x168] ss:$16 sps:$4 sm:$0xff]   ;;  %v1711_v48 = vld [vmem:[#allocation2 + $0x4] ss:$16 sps:$4 sm:$0xff]   ;;  %v1687_v50 = vld [vmem:[#allocation5 + $0x18c] ss:$16 sps:$4 sm:$0xff]  }
  0x5c   :  { %v1685_v49 = vld [vmem:[#allocation5 + $0x184] ss:$16 sps:$4 sm:$0xff]   ;;  %898 = vmatprep.mubr.bf16.mxu0 %v1711_v48  ;;  %984 = vmatprep.mubr.bf16.mxu1 %v1711_v48  ;;  %v1689_v51 = vld [vmem:[#allocation5 + $0x180] ss:$16 sps:$4 sm:$0xff]   ;;  %v1690_v52 = vld [vmem:[#allocation5 + $0x188] ss:$16 sps:$4 sm:$0xff]  }
  0x5d   :  { %875 = vmatpush1.bf16.msra.mxu0 %v1641_v18  ;;  %961 = vmatpush1.bf16.msra.mxu1 %v1642_v19  ;;  %v1691_v53 = vld [vmem:[#allocation5 + $0x1a4] ss:$16 sps:$4 sm:$0xff]   ;;  %v1693_v54 = vld [vmem:[#allocation5 + $0x1ac] ss:$16 sps:$4 sm:$0xff]   ;;  %v1695_v55 = vld [vmem:[#allocation5 + $0x1a0] ss:$16 sps:$4 sm:$0xff]  }
  0x5e   :  { %876 = vmatprep.subr.bf16.mxu0 %v1643_v20  ;;  %962 = vmatprep.subr.bf16.mxu1 %v1645_v21  ;;  %v1696_v56 = vld [vmem:[#allocation5 + $0x1a8] ss:$16 sps:$4 sm:$0xff]   ;;  %v1697_v57 = vld [vmem:[#allocation5 + $0x1c4] ss:$16 sps:$4 sm:$0xff]   ;;  %v1699_v58 = vld [vmem:[#allocation5 + $0x1cc] ss:$16 sps:$4 sm:$0xff]  }
  0x5f   :  { %v1701_v59 = vld [vmem:[#allocation5 + $0x1c0] ss:$16 sps:$4 sm:$0xff]   ;;  %v1702_v60 = vld [vmem:[#allocation5 + $0x1c8] ss:$16 sps:$4 sm:$0xff]   ;;  %v1703_v61 = vld [vmem:[#allocation5 + $0x1e4] ss:$16 sps:$4 sm:$0xff]  }
  0x60   :  { %v1705_v62 = vld [vmem:[#allocation5 + $0x1ec] ss:$16 sps:$4 sm:$0xff]   ;;  %v1707_v63 = vld [vmem:[#allocation5 + $0x1e0] ss:$16 sps:$4 sm:$0xff]   ;;  %v1708_v0 = vld [vmem:[#allocation5 + $0x1e8] ss:$16 sps:$4 sm:$0xff]  }
  0x61   :  { %877 = vmatpush1.bf16.msra.mxu0 %v1647_v22  ;;  %963 = vmatpush1.bf16.msra.mxu1 %v1648_v23  ;;  %v1714_v1 = vld [vmem:[#allocation5 + $0x204] ss:$16 sps:$4 sm:$0xff]   ;;  %v1717_v2 = vld [vmem:[#allocation5 + $0x20c] ss:$16 sps:$4 sm:$0xff]   ;;  %v1709_v3 = vld [vmem:[#allocation2] ss:$16 sps:$4 sm:$0xff]  }
  0x62   :  { %878 = vmatprep.subr.bf16.mxu0 %v1649_v24  ;;  %964 = vmatprep.subr.bf16.mxu1 %v1651_v25  ;;  %v1712_v4 = vld [vmem:[#allocation5 + $0x200] ss:$16 sps:$4 sm:$0xff]   ;;  %v1715_v5 = vld [vmem:[#allocation5 + $0x208] ss:$16 sps:$4 sm:$0xff]   ;;  %v1720_v6 = vld [vmem:[#allocation5 + $0x224] ss:$16 sps:$4 sm:$0xff]  }
  0x63   :  { %v1723_v7 = vld [vmem:[#allocation5 + $0x22c] ss:$16 sps:$4 sm:$0xff]   ;;  %v1718_v8 = vld [vmem:[#allocation5 + $0x220] ss:$16 sps:$4 sm:$0xff]   ;;  %v1721_v9 = vld [vmem:[#allocation5 + $0x228] ss:$16 sps:$4 sm:$0xff]  }
  0x64   :  { %v1726_v10 = vld [vmem:[#allocation5 + $0x244] ss:$16 sps:$4 sm:$0xff]   ;;  %v1729_v11 = vld [vmem:[#allocation5 + $0x24c] ss:$16 sps:$4 sm:$0xff]   ;;  %v1724_v12 = vld [vmem:[#allocation5 + $0x240] ss:$16 sps:$4 sm:$0xff]  }
  0x65   :  { %879 = vmatpush1.bf16.msra.mxu0 %v1653_v26  ;;  %965 = vmatpush1.bf16.msra.mxu1 %v1654_v27  ;;  %v1727_v13 = vld [vmem:[#allocation5 + $0x248] ss:$16 sps:$4 sm:$0xff]   ;;  %v1732_v14 = vld [vmem:[#allocation5 + $0x264] ss:$16 sps:$4 sm:$0xff]   ;;  %v1735_v15 = vld [vmem:[#allocation5 + $0x26c] ss:$16 sps:$4 sm:$0xff]  }
  0x66   :  { %880 = vmatprep.subr.bf16.mxu0 %v1655_v28  ;;  %966 = vmatprep.subr.bf16.mxu1 %v1657_v29  ;;  %v1730_v16 = vld [vmem:[#allocation5 + $0x260] ss:$16 sps:$4 sm:$0xff]   ;;  %v1733_v17 = vld [vmem:[#allocation5 + $0x268] ss:$16 sps:$4 sm:$0xff]   ;;  %v1738_v18 = vld [vmem:[#allocation5 + $0x284] ss:$16 sps:$4 sm:$0xff]  }
  0x67   :  { %v1741_v19 = vld [vmem:[#allocation5 + $0x28c] ss:$16 sps:$4 sm:$0xff]   ;;  %v1736_v20 = vld [vmem:[#allocation5 + $0x280] ss:$16 sps:$4 sm:$0xff]   ;;  %v1739_v21 = vld [vmem:[#allocation5 + $0x288] ss:$16 sps:$4 sm:$0xff]  }
  0x68   :  { %v1744_v22 = vld [vmem:[#allocation5 + $0x2a4] ss:$16 sps:$4 sm:$0xff]   ;;  %v1747_v23 = vld [vmem:[#allocation5 + $0x2ac] ss:$16 sps:$4 sm:$0xff]   ;;  %v1742_v24 = vld [vmem:[#allocation5 + $0x2a0] ss:$16 sps:$4 sm:$0xff]  }
  0x69   :  { %881 = vmatpush1.bf16.msra.mxu0 %v1659_v30  ;;  %967 = vmatpush1.bf16.msra.mxu1 %v1660_v31  ;;  %v1745_v25 = vld [vmem:[#allocation5 + $0x2a8] ss:$16 sps:$4 sm:$0xff]   ;;  %v1750_v26 = vld [vmem:[#allocation5 + $0x2c4] ss:$16 sps:$4 sm:$0xff]   ;;  %v1753_v27 = vld [vmem:[#allocation5 + $0x2cc] ss:$16 sps:$4 sm:$0xff]  }
  0x6a   :  { %882 = vmatprep.subr.bf16.mxu0 %v1661_v32  ;;  %968 = vmatprep.subr.bf16.mxu1 %v1663_v33  ;;  %v1748_v28 = vld [vmem:[#allocation5 + $0x2c0] ss:$16 sps:$4 sm:$0xff]   ;;  %v1751_v29 = vld [vmem:[#allocation5 + $0x2c8] ss:$16 sps:$4 sm:$0xff]   ;;  %v1810_v30 = vld [vmem:[#allocation2 + $0xc] ss:$16 sps:$4 sm:$0xff]  }
  0x6b   :  { %v1756_v31 = vld [vmem:[#allocation5 + $0x2e4] ss:$16 sps:$4 sm:$0xff]   ;;  %v1759_v32 = vld [vmem:[#allocation5 + $0x2ec] ss:$16 sps:$4 sm:$0xff]   ;;  %v1754_v33 = vld [vmem:[#allocation5 + $0x2e0] ss:$16 sps:$4 sm:$0xff]  }
  0x6c   :  { %v1783_v48 = vld [vmem:[#allocation5 + $0x36c] ss:$16 sps:$4 sm:$0xff]   ;;  %s1959_s3 = smov [#allocation10]  }
  0x6d   :  { %883 = vmatpush1.bf16.msra.mxu0 %v1665_v34  ;;  %969 = vmatpush1.bf16.msra.mxu1 %v1666_v35  ;;  %v1757_v34 = vld [vmem:[#allocation5 + $0x2e8] ss:$16 sps:$4 sm:$0xff]   ;;  %v1762_v35 = vld [vmem:[#allocation5 + $0x304] ss:$16 sps:$4 sm:$0xff]   ;;  %s1325_s13 = sshll.u32 %s1959_s3, 4  ;;  %s1326_s13 = int_to_ptr.vmem [resolvable:$true] %s1325_s13 }
  0x6e   :  { %884 = vmatprep.subr.bf16.mxu0 %v1667_v36  ;;  %970 = vmatprep.subr.bf16.mxu1 %v1669_v37  ;;  %v1765_v36 = vld [vmem:[#allocation5 + $0x30c] ss:$16 sps:$4 sm:$0xff]   ;;  %v1760_v37 = vld [vmem:[#allocation5 + $0x300] ss:$16 sps:$4 sm:$0xff]   ;;  %s1919_s14 = scalar_lea.vmem %s1326_s13, 256  ;;  %p1924_p5 = scmp.lt.s32.totalorder %s1326_s13, %s1326_s13 }
  0x6f   :  { %p1920_p4 = scmp.ne.s32.totalorder %s1326_s13, %s1919_s14  ;;  %p1925_p6 = scmp.lt.s32.totalorder %s1919_s14, %s1919_s14 }
  0x71   :  { %885 = vmatpush1.bf16.msra.mxu0 %v1671_v38  ;;  %971 = vmatpush1.bf16.msra.mxu1 %v1672_v39  ;;  %v1763_v38 = vld [vmem:[#allocation5 + $0x308] ss:$16 sps:$4 sm:$0xff]   ;;  %v1768_v39 = vld [vmem:[#allocation5 + $0x324] ss:$16 sps:$4 sm:$0xff]   ;;  %p1926_p7 = por %p1925_p6, %p1924_p5 }
  0x72   :  { %886 = vmatprep.subr.bf16.mxu0 %v1673_v40  ;;  %972 = vmatprep.subr.bf16.mxu1 %v1675_v41  ;;  %v1771_v40 = vld [vmem:[#allocation5 + $0x32c] ss:$16 sps:$4 sm:$0xff]   ;;  %v1766_v41 = vld [vmem:[#allocation5 + $0x320] ss:$16 sps:$4 sm:$0xff]  }
  0x73   :  { %p1927_p8 = pnand %p1926_p7, %p1920_p4 }
  0x75   :  { %887 = vmatpush1.bf16.msra.mxu0 %v1677_v42  ;;  %973 = vmatpush1.bf16.msra.mxu1 %v1678_v43  ;;  %v1769_v42 = vld [vmem:[#allocation5 + $0x328] ss:$16 sps:$4 sm:$0xff]   ;;  %v1774_v43 = vld [vmem:[#allocation5 + $0x344] ss:$16 sps:$4 sm:$0xff]  }
  0x76   :  { %888 = vmatprep.subr.bf16.mxu0 %v1679_v44  ;;  %974 = vmatprep.subr.bf16.mxu1 %v1681_v45  ;;  %v1777_v44 = vld [vmem:[#allocation5 + $0x34c] ss:$16 sps:$4 sm:$0xff]   ;;  %v1772_v45 = vld [vmem:[#allocation5 + $0x340] ss:$16 sps:$4 sm:$0xff]  }
  0x79   :  { %889 = vmatpush1.bf16.msra.mxu0 %v1683_v46  ;;  %975 = vmatpush1.bf16.msra.mxu1 %v1684_v47  ;;  %v1775_v46 = vld [vmem:[#allocation5 + $0x348] ss:$16 sps:$4 sm:$0xff]   ;;  %v1780_v47 = vld [vmem:[#allocation5 + $0x364] ss:$16 sps:$4 sm:$0xff]  }
  0x7a   :  { %890 = vmatprep.subr.bf16.mxu0 %v1685_v49  ;;  %976 = vmatprep.subr.bf16.mxu1 %v1687_v50  ;;  %v1778_v49 = vld [vmem:[#allocation5 + $0x360] ss:$16 sps:$4 sm:$0xff]   ;;  %v1781_v50 = vld [vmem:[#allocation5 + $0x368] ss:$16 sps:$4 sm:$0xff]  }
  0x7d   :  { %891 = vmatpush1.bf16.msra.mxu0 %v1689_v51  ;;  %977 = vmatpush1.bf16.msra.mxu1 %v1690_v52  ;;  %v1786_v51 = vld [vmem:[#allocation5 + $0x384] ss:$16 sps:$4 sm:$0xff]   ;;  %v1789_v52 = vld [vmem:[#allocation5 + $0x38c] ss:$16 sps:$4 sm:$0xff]  }
  0x7e   :  { %892 = vmatprep.subr.bf16.mxu0 %v1691_v53  ;;  %978 = vmatprep.subr.bf16.mxu1 %v1693_v54  ;;  %v1784_v53 = vld [vmem:[#allocation5 + $0x380] ss:$16 sps:$4 sm:$0xff]   ;;  %v1787_v54 = vld [vmem:[#allocation5 + $0x388] ss:$16 sps:$4 sm:$0xff]  }
  0x81   :  { %893 = vmatpush1.bf16.msra.mxu0 %v1695_v55  ;;  %979 = vmatpush1.bf16.msra.mxu1 %v1696_v56  ;;  %v1792_v55 = vld [vmem:[#allocation5 + $0x3a4] ss:$16 sps:$4 sm:$0xff]   ;;  %v1795_v56 = vld [vmem:[#allocation5 + $0x3ac] ss:$16 sps:$4 sm:$0xff]  }
  0x82   :  { %894 = vmatprep.subr.bf16.mxu0 %v1697_v57  ;;  %980 = vmatprep.subr.bf16.mxu1 %v1699_v58  ;;  %v1790_v57 = vld [vmem:[#allocation5 + $0x3a0] ss:$16 sps:$4 sm:$0xff]   ;;  %v1793_v58 = vld [vmem:[#allocation5 + $0x3a8] ss:$16 sps:$4 sm:$0xff]  }
  0x85   :  { %895 = vmatpush1.bf16.msra.mxu0 %v1701_v59  ;;  %981 = vmatpush1.bf16.msra.mxu1 %v1702_v60  ;;  %v1798_v59 = vld [vmem:[#allocation5 + $0x3c4] ss:$16 sps:$4 sm:$0xff]   ;;  %v1801_v60 = vld [vmem:[#allocation5 + $0x3cc] ss:$16 sps:$4 sm:$0xff]  }
  0x86   :  { %896 = vmatprep.subr.bf16.mxu0 %v1703_v61  ;;  %982 = vmatprep.subr.bf16.mxu1 %v1705_v62  ;;  %v1796_v61 = vld [vmem:[#allocation5 + $0x3c0] ss:$16 sps:$4 sm:$0xff]   ;;  %v1799_v62 = vld [vmem:[#allocation5 + $0x3c8] ss:$16 sps:$4 sm:$0xff]  }
  0x89   :  { %897 = vmatpush1.bf16.msra.mxu0 %v1707_v63  ;;  %983 = vmatpush1.bf16.msra.mxu1 %v1708_v0  ;;  %v1804_v63 = vld [vmem:[#allocation5 + $0x3e4] ss:$16 sps:$4 sm:$0xff]   ;;  %v1807_v0 = vld [vmem:[#allocation5 + $0x3ec] ss:$16 sps:$4 sm:$0xff]  }
  0x8a   :  { %909 = vmatprep.subr.bf16.mxu0 %v1714_v1  ;;  %995 = vmatprep.subr.bf16.mxu1 %v1717_v2  ;;  %v1802_v1 = vld [vmem:[#allocation5 + $0x3e0] ss:$16 sps:$4 sm:$0xff]   ;;  %v1805_v2 = vld [vmem:[#allocation5 + $0x3e8] ss:$16 sps:$4 sm:$0xff]  }
  0x8c   :  { %899 = vmatmul.mubr.bf16.vlgmr.msra.gmra.mrb[0].mxu0 %v1709_v3  ;;  %985 = vmatmul.mubr.bf16.vlgmr.msra.gmra.mrb[0].mxu1 %v1709_v3  ;;  %v1811_v3 = vld [vmem:[#allocation7 + $0x40] sm:$0xff]  }
  0x8d   :  { %910 = vmatpush1.bf16.msra.mxu0 %v1712_v4  ;;  %996 = vmatpush1.bf16.msra.mxu1 %v1715_v5  ;;  %v1808_v4 = vld [vmem:[#allocation2 + $0x8] ss:$16 sps:$4 sm:$0xff]   ;;  %v1812_v5 = vld [vmem:[#allocation7] sm:$0xff]  }
  0x8e   :  { %911 = vmatprep.subr.bf16.mxu0 %v1720_v6  ;;  %997 = vmatprep.subr.bf16.mxu1 %v1723_v7  ;;  %v1813_v6 = vld [vmem:[#allocation7 + $0x48] sm:$0xff]  }
  0x8f   :  { %941 = vmatprep.mubr.bf16.mxu0 %v1810_v30  ;;  %1027 = vmatprep.mubr.bf16.mxu1 %v1810_v30  ;;  %v1814_v7 = vld [vmem:[#allocation7 + $0x8] sm:$0xff]  }
  0x91   :  { %912 = vmatpush1.bf16.msra.mxu0 %v1718_v8  ;;  %998 = vmatpush1.bf16.msra.mxu1 %v1721_v9  ;;  %v1815_v8 = vld [vmem:[#allocation7 + $0x50] sm:$0xff]  }
  0x92   :  { %913 = vmatprep.subr.bf16.mxu0 %v1726_v10  ;;  %999 = vmatprep.subr.bf16.mxu1 %v1729_v11  ;;  %v1816_v9 = vld [vmem:[#allocation7 + $0x10] sm:$0xff]   ;;  %v1817_v10 = vld [vmem:[#allocation7 + $0x58] sm:$0xff]  }
  0x93   :  { %v1818_v11 = vld [vmem:[#allocation7 + $0x18] sm:$0xff]  }
  0x95   :  { %914 = vmatpush1.bf16.msra.mxu0 %v1724_v12  ;;  %1000 = vmatpush1.bf16.msra.mxu1 %v1727_v13  ;;  %v1819_v12 = vld [vmem:[#allocation7 + $0x60] sm:$0xff]  }
  0x96   :  { %915 = vmatprep.subr.bf16.mxu0 %v1732_v14  ;;  %1001 = vmatprep.subr.bf16.mxu1 %v1735_v15  ;;  %v1820_v13 = vld [vmem:[#allocation7 + $0x20] sm:$0xff]   ;;  %v1821_v14 = vld [vmem:[#allocation7 + $0x68] sm:$0xff]  }
  0x97   :  { %v1822_v15 = vld [vmem:[#allocation7 + $0x28] sm:$0xff]  }
  0x99   :  { %916 = vmatpush1.bf16.msra.mxu0 %v1730_v16  ;;  %1002 = vmatpush1.bf16.msra.mxu1 %v1733_v17  ;;  %v1823_v16 = vld [vmem:[#allocation7 + $0x70] sm:$0xff]  }
  0x9a   :  { %917 = vmatprep.subr.bf16.mxu0 %v1738_v18  ;;  %1003 = vmatprep.subr.bf16.mxu1 %v1741_v19  ;;  %v1824_v17 = vld [vmem:[#allocation7 + $0x30] sm:$0xff]   ;;  %v1825_v18 = vld [vmem:[#allocation7 + $0x78] sm:$0xff]  }
  0x9b   :  { %v1826_v19 = vld [vmem:[#allocation7 + $0x38] sm:$0xff]  }
  0x9d   :  { %918 = vmatpush1.bf16.msra.mxu0 %v1736_v20  ;;  %1004 = vmatpush1.bf16.msra.mxu1 %v1739_v21  ;;  %v1227_v20 = vld [vmem:[#allocation8] sm:$0xff]  ;;  %v1228_v21 = vld [vmem:[#allocation8 + $0x8] sm:$0xff] }
  0x9e   :  { %919 = vmatprep.subr.bf16.mxu0 %v1744_v22  ;;  %1005 = vmatprep.subr.bf16.mxu1 %v1747_v23  ;;  %v1229_v22 = vld [vmem:[#allocation8 + $0x10] sm:$0xff]  ;;  %v1562_v23 = vpack.c.bf16 %v1228_v21, %v1227_v20 }
  0xa1   :  { %920 = vmatpush1.bf16.msra.mxu0 %v1742_v24  ;;  %1006 = vmatpush1.bf16.msra.mxu1 %v1745_v25  ;;  %v1230_v24 = vld [vmem:[#allocation8 + $0x18] sm:$0xff] }
  0xa2   :  { %921 = vmatprep.subr.bf16.mxu0 %v1750_v26  ;;  %1007 = vmatprep.subr.bf16.mxu1 %v1753_v27  ;;  %v1566_v25 = vpack.c.bf16 %v1230_v24, %v1229_v22  ;;  %v1231_v26 = vld [vmem:[#allocation8 + $0x20] sm:$0xff]  ;;  %v1232_v27 = vld [vmem:[#allocation8 + $0x28] sm:$0xff] }
  0xa5   :  { %922 = vmatpush1.bf16.msra.mxu0 %v1748_v28  ;;  %1008 = vmatpush1.bf16.msra.mxu1 %v1751_v29  ;;  %v1570_v28 = vpack.c.bf16 %v1232_v27, %v1231_v26 }
  0xa6   :  { %923 = vmatprep.subr.bf16.mxu0 %v1756_v31  ;;  %1009 = vmatprep.subr.bf16.mxu1 %v1759_v32 }
  0xa9   :  { %924 = vmatpush1.bf16.msra.mxu0 %v1754_v33  ;;  %1010 = vmatpush1.bf16.msra.mxu1 %v1757_v34 }
  0xaa   :  { %925 = vmatprep.subr.bf16.mxu0 %v1762_v35  ;;  %1011 = vmatprep.subr.bf16.mxu1 %v1765_v36 }
  0xad   :  { %926 = vmatpush1.bf16.msra.mxu0 %v1760_v37  ;;  %1012 = vmatpush1.bf16.msra.mxu1 %v1763_v38 }
  0xae   :  { %927 = vmatprep.subr.bf16.mxu0 %v1768_v39  ;;  %1013 = vmatprep.subr.bf16.mxu1 %v1771_v40 }
  0xb1   :  { %928 = vmatpush1.bf16.msra.mxu0 %v1766_v41  ;;  %1014 = vmatpush1.bf16.msra.mxu1 %v1769_v42 }
  0xb2   :  { %929 = vmatprep.subr.bf16.mxu0 %v1774_v43  ;;  %1015 = vmatprep.subr.bf16.mxu1 %v1777_v44 }
  0xb5   :  { %930 = vmatpush1.bf16.msra.mxu0 %v1772_v45  ;;  %1016 = vmatpush1.bf16.msra.mxu1 %v1775_v46 }
  0xb6   :  { %931 = vmatprep.subr.bf16.mxu0 %v1780_v47  ;;  %1017 = vmatprep.subr.bf16.mxu1 %v1783_v48 }
  0xb9   :  { %932 = vmatpush1.bf16.msra.mxu0 %v1778_v49  ;;  %1018 = vmatpush1.bf16.msra.mxu1 %v1781_v50 }
  0xba   :  { %933 = vmatprep.subr.bf16.mxu0 %v1786_v51  ;;  %1019 = vmatprep.subr.bf16.mxu1 %v1789_v52  ;;  %v1233_v51 = vld [vmem:[#allocation8 + $0x30] sm:$0xff]  ;;  %v1234_v52 = vld [vmem:[#allocation8 + $0x38] sm:$0xff] }
  0xbd   :  { %934 = vmatpush1.bf16.msra.mxu0 %v1784_v53  ;;  %1020 = vmatpush1.bf16.msra.mxu1 %v1787_v54  ;;  %v1574_v53 = vpack.c.bf16 %v1234_v52, %v1233_v51  ;;  %v1235_v54 = vld [vmem:[#allocation8 + $0x40] sm:$0xff] }
  0xbe   :  { %935 = vmatprep.subr.bf16.mxu0 %v1792_v55  ;;  %1021 = vmatprep.subr.bf16.mxu1 %v1795_v56  ;;  %v1236_v55 = vld [vmem:[#allocation8 + $0x48] sm:$0xff] }
  0xbf   :  { %v1578_v56 = vpack.c.bf16 %v1236_v55, %v1235_v54 }
  0xc1   :  { %936 = vmatpush1.bf16.msra.mxu0 %v1790_v57  ;;  %1022 = vmatpush1.bf16.msra.mxu1 %v1793_v58  ;;  %v1237_v57 = vld [vmem:[#allocation8 + $0x50] sm:$0xff]  ;;  %v1238_v58 = vld [vmem:[#allocation8 + $0x58] sm:$0xff] }
  0xc2   :  { %937 = vmatprep.subr.bf16.mxu0 %v1798_v59  ;;  %1023 = vmatprep.subr.bf16.mxu1 %v1801_v60  ;;  %v1582_v59 = vpack.c.bf16 %v1238_v58, %v1237_v57  ;;  %v1239_v60 = vld [vmem:[#allocation8 + $0x60] sm:$0xff] }
  0xc5   :  { %938 = vmatpush1.bf16.msra.mxu0 %v1796_v61  ;;  %1024 = vmatpush1.bf16.msra.mxu1 %v1799_v62  ;;  %v1240_v61 = vld [vmem:[#allocation8 + $0x68] sm:$0xff] }
  0xc6   :  { %939 = vmatprep.subr.bf16.mxu0 %v1804_v63  ;;  %1025 = vmatprep.subr.bf16.mxu1 %v1807_v0  ;;  %v1586_v62 = vpack.c.bf16 %v1240_v61, %v1239_v60  ;;  %v1241_v63 = vld [vmem:[#allocation8 + $0x70] sm:$0xff]  ;;  %v1242_v0 = vld [vmem:[#allocation8 + $0x78] sm:$0xff] }
  0xc9   :  { %940 = vmatpush1.bf16.msra.mxu0 %v1802_v1  ;;  %1026 = vmatpush1.bf16.msra.mxu1 %v1805_v2  ;;  %v1590_v1 = vpack.c.bf16 %v1242_v0, %v1241_v63 }
  0xca   :  { %1487 = vmatprep.subr.bf16.mxu0 %v1811_v3  ;;  %1563 = vmatprep.subr.bf16.mxu1 %v1562_v23 }
  0xcc   :  { %942 = vmatmul.mubr.bf16.vlgmr.msra.gmra.mrb[0].mxu0 %v1808_v4  ;;  %1028 = vmatmul.mubr.bf16.vlgmr.msra.gmra.mrb[0].mxu1 %v1808_v4 }
  0xcd   :  { %1488 = vmatpush3.bf16.msra.mxu0 %v1812_v5  ;;  %1565 = vmatpush3.bf16.msra.mxu1 %v1562_v23 }
  0xce   :  { %1489 = vmatprep.subr.bf16.mxu0 %v1813_v6  ;;  %1567 = vmatprep.subr.bf16.mxu1 %v1566_v25 }
  0xd1   :  { %1490 = vmatpush3.bf16.msra.mxu0 %v1814_v7  ;;  %1569 = vmatpush3.bf16.msra.mxu1 %v1566_v25 }
  0xd2   :  { %1491 = vmatprep.subr.bf16.mxu0 %v1815_v8  ;;  %1571 = vmatprep.subr.bf16.mxu1 %v1570_v28 }
  0xd5   :  { %1492 = vmatpush3.bf16.msra.mxu0 %v1816_v9  ;;  %1573 = vmatpush3.bf16.msra.mxu1 %v1570_v28 }
  0xd6   :  { %1493 = vmatprep.subr.bf16.mxu0 %v1817_v10  ;;  %1575 = vmatprep.subr.bf16.mxu1 %v1574_v53 }
  0xd9   :  { %1494 = vmatpush3.bf16.msra.mxu0 %v1818_v11  ;;  %1577 = vmatpush3.bf16.msra.mxu1 %v1574_v53 }
  0xda   :  { %1495 = vmatprep.subr.bf16.mxu0 %v1819_v12  ;;  %1579 = vmatprep.subr.bf16.mxu1 %v1578_v56 }
  0xdd   :  { %1496 = vmatpush3.bf16.msra.mxu0 %v1820_v13  ;;  %1581 = vmatpush3.bf16.msra.mxu1 %v1578_v56 }
  0xde   :  { %1497 = vmatprep.subr.bf16.mxu0 %v1821_v14  ;;  %1583 = vmatprep.subr.bf16.mxu1 %v1582_v59 }
  0xe1   :  { %1498 = vmatpush3.bf16.msra.mxu0 %v1822_v15  ;;  %1585 = vmatpush3.bf16.msra.mxu1 %v1582_v59 }
  0xe2   :  { %1499 = vmatprep.subr.bf16.mxu0 %v1823_v16  ;;  %1587 = vmatprep.subr.bf16.mxu1 %v1586_v62 }
  0xe5   :  { %1500 = vmatpush3.bf16.msra.mxu0 %v1824_v17  ;;  %1589 = vmatpush3.bf16.msra.mxu1 %v1586_v62 }
  0xe6   :  { %1501 = vmatprep.subr.bf16.mxu0 %v1825_v18  ;;  %1591 = vmatprep.subr.bf16.mxu1 %v1590_v1 }
  0xe9   :  { %1502 = vmatpush3.bf16.msra.mxu0 %v1826_v19  ;;  %1593 = vmatpush3.bf16.msra.mxu1 %v1590_v1 }
 0x19f   :  { %v943_v29 = vpop.f32.mrb[0].mxu0  ;;  %v1029_v30 = vpop.f32.mrb[0].mxu1 }
 0x1a0   :  { %v1038_v31 = vmul.f32 %v943_v29, %v943_v29  ;;  %v1042_v32 = vmul.f32 %v1029_v30, %v1029_v30  ;;  %v945_v33 = vpop.f32.mrb[1].mxu0  ;;  %v1031_v34 = vpop.f32.mrb[1].mxu1 }
 0x1a1   :  { %v1039_v35 = vmul.f32 %v945_v33, %v945_v33  ;;  %v1043_v36 = vmul.f32 %v1031_v34, %v1031_v34  ;;  %v947_v37 = vpop.f32.mrb[2].mxu0  ;;  %v1033_v38 = vpop.f32.mrb[2].mxu1 }
 0x1a2   :  { %v1046_v39 = vadd.f32 %v1042_v32, %v1038_v31  ;;  %v1040_v40 = vmul.f32 %v947_v37, %v947_v37  ;;  %v1044_v41 = vmul.f32 %v1033_v38, %v1033_v38  ;;  %v949_v42 = vpop.f32.mrb[3].mxu0  ;;  %v1035_v43 = vpop.f32.mrb[3].mxu1 }
 0x1a3   :  { %v1047_v44 = vadd.f32 %v1043_v36, %v1039_v35  ;;  %v1041_v45 = vmul.f32 %v949_v42, %v949_v42  ;;  %v1045_v46 = vmul.f32 %v1035_v43, %v1035_v43 }
 0x1a4   :  { %v1048_v47 = vadd.f32 %v1044_v41, %v1040_v40 }
 0x1a5   :  { %v1049_v48 = vadd.f32 %v1045_v46, %v1041_v45 }
 0x1a6   :  { %v1050_v49 = vpack.c.bf16 %v1048_v47, %v1046_v39 }
 0x1a7   :  { %v1051_v50 = vpack.c.bf16 %v1049_v48, %v1047_v44 }
 0x1a9   :  { %1212 = vmatprep.mubr.bf16.mxu0 %v1051_v50 }
 0x1aa   :  { %1213 = vmatmul.mubr.bf16.vlgmr.msra.gmra.mrb[4].mxu0 %v1050_v49 }
 0x27d   :  { %v1503_v2 = vpop.f32.mrb[4].mxu0 }
 0x27e   :  { %v1504_v3 = vpop.f32.mrb[5].mxu0 }
 0x27f   :  { %v1505_v4 = vadd.f32 %v1504_v3, %v1503_v2  ;;  %v1506_v5 = vpop.f32.mrb[6].mxu0 }
 0x280   :  { %v1507_v6 = vpop.f32.mrb[7].mxu0 }
 0x281   :  { %v1221_v7 = vmax.f32 %v1505_v4, 1e-10  ;;  %v1508_v8 = vadd.f32 %v1507_v6, %v1506_v5 }
 0x283   :  { %1827 = vlog2.f32 %v1221_v7  ;;  %v1222_v9 = vmax.f32 %v1508_v8, 1e-10 }
 0x285   :  { %1829 = vlog2.f32 %v1222_v9 }
 0x28d   :  { %v1828_v10 = vpop.eup %1827 }
 0x28e   :  { %v1224_v11 = vmul.f32 0.6931472, %v1828_v10 }
 0x28f   :  { %v1830_v12 = vpop.eup %1829 }
 0x290   :  { %v1226_v13 = vmul.f32 0.6931472, %v1830_v12  ;;  %1559 = vmatprep.mubr.f32.mxu1 %v1224_v11 }
 0x292   :  { %1560 = vmatmul.mubr.f32.vlgmr.msra.gmra.mrb[4].mxu1 %v1226_v13 }
 0x365   :  { %v1561_v14 = vpop.f32.mrb[4].mxu1 }
 0x366   :  { %1319 = vst [vmem:[#allocation10 + $0x8] sm:$0xff] %v1561_v14  ;;  %v1309_v15 = vpop.f32.mrb[5].mxu1 }
 0x367   :  { %1318 = vst [vmem:[#allocation10] sm:$0xff] %v1309_v15 }
 0x368   :  { %1930 = shalt.err (!%p1927_p8)
}
 0x369   :  { %s1931_s17 = scalar_lea.hbm %s2062_s4, 256 }
 0x36a   :  { %p1932_p9 = scmp.ne.s32.totalorder %s2062_s4, %s1931_s17  ;;  %p1935_p10 = scmp.lt.u32.totalorder %s1931_s17, %s2062_s4 }
 0x36c   :  { %p1937_p11 = pnand %p1935_p10, %p1932_p9 }
 0x36e   :  { %1940 = shalt.err (!%p1937_p11)
}
 0x36f   :  { %1331 = dma.vmem_to_hbm [thread:$0]  %s1326_s13, 256, %s2062_s4, [#allocation4], %s1957_s2, %s1957_s2, %s1958_s11  }
 0x370   :  { %1947 = dma.done.wait [#allocation4], 256  }
 0x371   :  { %1948 = vsyncadd [#allocation4], 4294967040 }
 0x372   :  { %1335 = vsyncpa [#allocation3], 1 }
 0x373   :  { %1336 = vsyncpa [#allocation6], 1 }
 0x374   :  { %1337 = vsyncpa [#allocation9], 1 }
 0x375   :  { %1338 = vsyncpa [#allocation4], 1 }

</bundles_post_ra>
